<compile_context>
chip_gen: v7x
topology: tpu7x:2x2x1
jax: 0.10.0
libtpu: 0.0.40
codegen_flags: <defaults>
</compile_context>

<pallas_src>
import jax
import jax.numpy as jnp
from jax.experimental import pallas as pl
from jax.experimental.pallas import tpu as pltpu

# ---- deterministic "module parameters" (from __init__) ----
POS_WEIGHT = 2.0   # pos_weight for BCEWithLogitsLoss (scalar)
BD_WEIGHT = 0.5    # bd_weight
LAMBDA_B = 0.5     # lambda_b
LAMBDA_T = 1.0     # lambda_t
SMOOTH = 1e-5


# ---------------- fused kernel ----------------
# One grid step == one batch element b.  Output row (8 scalars, broadcast over
# 128 lanes for a dense store):
#   [0] sum of BCE-with-logits terms (with pos_weight) over C*H*W elements
#   [1] sum(sigmoid(logits0) * target0)            (intersect)
#   [2] sum(target0 * target0)                     (y_sum)
#   [3] sum(sigmoid(logits0)^2)                    (z_sum)
#   [4] count_nonzero(Y), Y = (3x3 cross conv of target0)*target0, Y==5 -> 0
#   [5] count_nonzero(target0)
#   [6] -log( clamp(cos(v_f_b, u_f_b), 1e-4, 1) )
#   [7] -log( 1 - clamp(cos(v_b_b, u_f_b), 1e-4, 1-1e-4) )
def _fused_loss_kernel(logits_ref, target_ref, vf_ref, vb_ref, uf_ref,
                       band_h_ref, band_w_ref, out_ref):
    b = pl.program_id(0)

    x = logits_ref[...].astype(jnp.float32)          # (C, H, W)
    y = target_ref[...].astype(jnp.float32)          # (C, H, W)

    # ---- BCE-with-logits partial sum over all channels of this batch -------
    # Single transcendental path:  -log sigma(x) = softplus(-x),
    #                              -log(1-sigma(x)) = x + softplus(-x)
    sp = jax.nn.softplus(-x)
    bce = (1.0 - y) * x + (POS_WEIGHT * y + (1.0 - y)) * sp
    bce_sum = jnp.sum(bce)

    # ---- boundary-sensitive (dice-like) terms on channel 0 -----------------
    t0 = y[0]                                        # (H, W) static slice
    sp0 = sp[0]
    s0 = jnp.exp(-sp0)                               # == sigmoid(logits[:, 0])
    intersect = jnp.sum(s0 * t0)
    y_sum = jnp.sum(t0 * t0)
    z_sum = jnp.sum(s0 * s0)

    # 3x3 cross conv (kernel [[0,1,0],[1,1,1],[0,1,0]]) with zero padding:
    #   conv = band_H @ t0 + t0 @ band_W - t0
    # Band matrices are resident bf16 VMEM constants; bf16 is exact for a
    # binary {0,1} mask (sums <= 5).
    t0b = t0.astype(jnp.bfloat16)
    conv = (jnp.dot(band_h_ref[...], t0b, preferred_element_type=jnp.float32)
            + jnp.dot(t0b, band_w_ref[...], preferred_element_type=jnp.float32)
            - t0)
    yv = conv * t0
    yv = jnp.where(yv == 5.0, 0.0, yv)
    cnt_c = jnp.sum((yv != 0.0).astype(jnp.float32))   # C
    cnt_s = jnp.sum((t0 != 0.0).astype(jnp.float32))   # S

    # ---- per-batch match (cosine similarity) loss terms ---------------------
    vf = vf_ref[pl.ds(b, 1), :].astype(jnp.float32)     # (1, D)
    vb = vb_ref[pl.ds(b, 1), :].astype(jnp.float32)
    uf = uf_ref[pl.ds(b, 1), :].astype(jnp.float32)
    eps = 1e-8

    def cos(a, c):
        num = jnp.sum(a * c)
        na = jnp.sqrt(jnp.sum(a * a))
        nb = jnp.sqrt(jnp.sum(c * c))
        return num / jnp.maximum(na * nb, eps)

    sim_f = jnp.clip(cos(vf, uf), 1e-4, 1.0)
    sim_b = jnp.clip(cos(vb, uf), 1e-4, 1.0 - 1e-4)
    mf = -jnp.log(sim_f)
    mb = -jnp.log(1.0 - sim_b)

    # ---- pack the 8 per-batch scalars into a lane-dense (8, 128) tile ------
    vals = (bce_sum, intersect, y_sum, z_sum, cnt_c, cnt_s, mf, mb)
    ridx = jax.lax.broadcasted_iota(jnp.int32, (8, 128), 0)
    tile = jnp.zeros((8, 128), jnp.float32)
    for k, v in enumerate(vals):
        tile = jnp.where(ridx == k, v, tile)
    out_ref[...] = tile


def _band_matrix(n):
    i = jnp.arange(n)[:, None]
    j = jnp.arange(n)[None, :]
    return (jnp.abs(i - j) <= 1).astype(jnp.bfloat16)


def _fused_sums(low_res_logits, target, v_f, v_b, u_f):
    B, C, H, W = low_res_logits.shape

    band_h = _band_matrix(H)        # (H, H) bf16, resident VMEM constant
    band_w = _band_matrix(W)        # (W, W) bf16, resident VMEM constant

    # One (C, H, W) slab per grid step; block = full extent on the last two
    # dims so the channel-0 conv needs no halo exchange and the (8,128) rule
    # is satisfied (full-dim blocks).
    slab_spec = pl.BlockSpec((None, C, H, W), lambda b: (b, 0, 0, 0))
    small_vmem = pl.BlockSpec(memory_space=pltpu.MemorySpace.VMEM)

    # VMEM budget: 2 double-buffered input slabs + f32 temporaries + headroom,
    # clamped so the same tiling fits v7x's 64 MiB VMEM (raise toward 96-128
    # MiB on v5e/v6e only if chunking is added for very large planes).
    in_slab_bytes = C * H * W * (low_res_logits.dtype.itemsize
                                 + target.dtype.itemsize)
    f32_plane = C * H * W * 4
    budget = 2 * in_slab_bytes + 10 * f32_plane + (4 << 20)
    vmem_limit = int(min(max(budget, 32 << 20), 56 << 20))

    out = pl.pallas_call(
        _fused_loss_kernel,
        out_shape=jax.ShapeDtypeStruct((B, 8, 128), jnp.float32),
        grid=(B,),
        in_specs=[slab_spec, slab_spec,
                  small_vmem, small_vmem, small_vmem,   # v_f, v_b, u_f
                  small_vmem, small_vmem],              # band_h, band_w
        out_specs=pl.BlockSpec((None, 8, 128), lambda b: (b, 0, 0)),
        compiler_params=pltpu.CompilerParams(
            # Disjoint per-b output blocks -> batch axis is megacore-parallel.
            dimension_semantics=("parallel",),
            vmem_limit_bytes=vmem_limit,
        ),
    )(low_res_logits, target, v_f, v_b, u_f, band_h, band_w)

    return out[:, :, 0]                                 # (B, 8)


@jax.jit
def match_and_mask_bd_and_bce_loss(v_f, v_b, u_f, low_res_logits, target):
    B, C, H, W = low_res_logits.shape

    rows = _fused_sums(low_res_logits, target, v_f, v_b, u_f)   # (B, 8)
    totals = jnp.sum(rows, axis=0)                              # (8,)
    bce_sum, intersect, y_sum, z_sum = totals[0], totals[1], totals[2], totals[3]
    cnt_c, cnt_s, match_f, match_b = totals[4], totals[5], totals[6], totals[7]

    # BCEWithLogitsLoss, reduction='mean'
    bec_loss = bce_sum / (B * C * H * W)

    # BoundarySensitiveLoss._adaptive_size scalar epilogue
    alpha = 1.0 - (cnt_c + SMOOTH) / (cnt_s + SMOOTH)
    alpha = 2.0 * alpha - 1.0
    alpha = jnp.minimum(alpha, 0.8)
    bd_loss = (z_sum + y_sum - 2.0 * intersect + SMOOTH) / (
        z_sum + y_sum - (1.0 + alpha) * intersect + SMOOTH)

    # match loss: mean over batch of -(log sim_f + lambda_b * log(1 - sim_b))
    mat_loss = (match_f + LAMBDA_B * match_b) / v_f.shape[0]

    pic_loss = (1.0 - BD_WEIGHT) * bec_loss + BD_WEIGHT * bd_loss
    return pic_loss + LAMBDA_T * mat_loss


if __name__ == "__main__":
    key = jax.random.PRNGKey(0)
    k1, k2, k3, k4, k5 = jax.random.split(key, 5)

    B, C, H, W = 2, 4, 16, 16
    D = 32

    low_res_logits = jax.random.normal(k1, (B, C, H, W), dtype=jnp.float32)
    # binary mask target passed as bf16: exact for {0,1} and half the HBM bytes
    target = (jax.random.uniform(k2, (B, C, H, W)) > 0.5).astype(jnp.bfloat16)
    v_f = jax.random.normal(k3, (B, D), dtype=jnp.float32)
    v_b = jax.random.normal(k4, (B, D), dtype=jnp.float32)
    u_f = jax.random.normal(k5, (B, D), dtype=jnp.float32)

    loss = match_and_mask_bd_and_bce_loss(v_f, v_b, u_f, low_res_logits, target)
    jax.block_until_ready(loss)
    assert loss.shape == () and jnp.isfinite(loss)
    print("KERNEL_OK")
</pallas_src>

<mosaic_0001>
module attributes {stable_mosaic.version = 11 : i64} {
  func.func @_fused_loss_kernel(%arg0: i32, %arg1: memref<1x4x16x16xf32, #tpu.memory_space<vmem>>, %arg2: memref<1x4x16x16xbf16, #tpu.memory_space<vmem>>, %arg3: memref<2x32xf32, #tpu.memory_space<vmem>>, %arg4: memref<2x32xf32, #tpu.memory_space<vmem>>, %arg5: memref<2x32xf32, #tpu.memory_space<vmem>>, %arg6: memref<16x16xbf16, #tpu.memory_space<vmem>>, %arg7: memref<16x16xbf16, #tpu.memory_space<vmem>>, %arg8: memref<1x8x128xf32, #tpu.memory_space<vmem>>) attributes {dimension_semantics = [#tpu.dimension_semantics<parallel>], iteration_bounds = array<i64: 2>, scalar_prefetch = 0 : i64, scratch_operands = 0 : i64, tpu.core_type = #tpu.core_type<tc>, window_params = [{transform_indices = @transform_0, window_bounds = array<i64: 1, 4, 16, 16>}, {transform_indices = @transform_1, window_bounds = array<i64: 1, 4, 16, 16>}, {pipeline_mode = #tpu.pipeline_mode<synchronous>, transform_indices = @transform_2, window_bounds = array<i64: 2, 32>}, {pipeline_mode = #tpu.pipeline_mode<synchronous>, transform_indices = @transform_3, window_bounds = array<i64: 2, 32>}, {pipeline_mode = #tpu.pipeline_mode<synchronous>, transform_indices = @transform_4, window_bounds = array<i64: 2, 32>}, {pipeline_mode = #tpu.pipeline_mode<synchronous>, transform_indices = @transform_5, window_bounds = array<i64: 16, 16>}, {pipeline_mode = #tpu.pipeline_mode<synchronous>, transform_indices = @transform_6, window_bounds = array<i64: 16, 16>}, {transform_indices = @transform_7, window_bounds = array<i64: 1, 8, 128>}]} {
    %c0 = arith.constant 0 : index
    %c0_0 = arith.constant 0 : index
    %c0_1 = arith.constant 0 : index
    %c0_2 = arith.constant 0 : index
    %0 = vector.load %arg1[%c0, %c0_0, %c0_1, %c0_2] : memref<1x4x16x16xf32, #tpu.memory_space<vmem>>, vector<1x4x16x16xf32>
    %1 = vector.shape_cast %0 : vector<1x4x16x16xf32> to vector<4x16x16xf32>
    %c0_3 = arith.constant 0 : index
    %c0_4 = arith.constant 0 : index
    %c0_5 = arith.constant 0 : index
    %c0_6 = arith.constant 0 : index
    %2 = vector.load %arg2[%c0_3, %c0_4, %c0_5, %c0_6] : memref<1x4x16x16xbf16, #tpu.memory_space<vmem>>, vector<1x4x16x16xbf16>
    %3 = vector.shape_cast %2 : vector<1x4x16x16xbf16> to vector<4x16x16xbf16>
    %4 = arith.extf %3 : vector<4x16x16xbf16> to vector<4x16x16xf32>
    %cst = arith.constant 0.000000e+00 : f32
    %5 = vector.broadcast %cst : f32 to vector<4x16x16xf32>
    %6 = arith.subf %5, %1 : vector<4x16x16xf32>
    %cst_7 = arith.constant 0.000000e+00 : f32
    %7 = vector.broadcast %cst_7 : f32 to vector<4x16x16xf32>
    %8 = arith.maximumf %6, %7 : vector<4x16x16xf32>
    %9 = vector.broadcast %cst_7 : f32 to vector<4x16x16xf32>
    %10 = arith.subf %6, %9 : vector<4x16x16xf32>
    %11 = arith.cmpf one, %10, %10 : vector<4x16x16xf32>
    %12 = vector.broadcast %cst_7 : f32 to vector<4x16x16xf32>
    %13 = arith.addf %6, %12 : vector<4x16x16xf32>
    %14 = math.absf %10 : vector<4x16x16xf32>
    %cst_8 = arith.constant 0.000000e+00 : f32
    %15 = vector.broadcast %cst_8 : f32 to vector<4x16x16xf32>
    %16 = arith.subf %15, %14 : vector<4x16x16xf32>
    %17 = math.exp %16 : vector<4x16x16xf32>
    %18 = math.log1p %17 : vector<4x16x16xf32>
    %19 = arith.addf %8, %18 : vector<4x16x16xf32>
    %20 = arith.select %11, %13, %19 : vector<4x16x16xi1>, vector<4x16x16xf32>
    %cst_9 = arith.constant 1.000000e+00 : f32
    %21 = vector.broadcast %cst_9 : f32 to vector<4x16x16xf32>
    %22 = arith.subf %21, %4 : vector<4x16x16xf32>
    %23 = arith.mulf %22, %1 : vector<4x16x16xf32>
    %cst_10 = arith.constant 2.000000e+00 : f32
    %24 = vector.broadcast %cst_10 : f32 to vector<4x16x16xf32>
    %25 = arith.mulf %24, %4 : vector<4x16x16xf32>
    %cst_11 = arith.constant 1.000000e+00 : f32
    %26 = vector.broadcast %cst_11 : f32 to vector<4x16x16xf32>
    %27 = arith.subf %26, %4 : vector<4x16x16xf32>
    %28 = arith.addf %25, %27 : vector<4x16x16xf32>
    %29 = arith.mulf %28, %20 : vector<4x16x16xf32>
    %30 = arith.addf %23, %29 : vector<4x16x16xf32>
    %31 = vector.shape_cast %30 : vector<4x16x16xf32> to vector<1x4x16x16xf32>
    %cst_12 = arith.constant dense<0.000000e+00> : vector<1xf32>
    %32 = vector.multi_reduction <add>, %31, %cst_12 [1, 2, 3] : vector<1x4x16x16xf32> to vector<1xf32>
    %33 = vector.shape_cast %32 : vector<1xf32> to vector<1x1x1x1xf32>
    %34 = vector.extract %33[0, 0, 0, 0] : f32 from vector<1x1x1x1xf32>
    %35 = vector.extract_strided_slice %4 {offsets = [0, 0, 0], sizes = [1, 16, 16], strides = [1, 1, 1]} : vector<4x16x16xf32> to vector<1x16x16xf32>
    %36 = vector.shape_cast %35 : vector<1x16x16xf32> to vector<16x16xf32>
    %37 = vector.extract_strided_slice %20 {offsets = [0, 0, 0], sizes = [1, 16, 16], strides = [1, 1, 1]} : vector<4x16x16xf32> to vector<1x16x16xf32>
    %38 = vector.shape_cast %37 : vector<1x16x16xf32> to vector<16x16xf32>
    %cst_13 = arith.constant 0.000000e+00 : f32
    %39 = vector.broadcast %cst_13 : f32 to vector<16x16xf32>
    %40 = arith.subf %39, %38 : vector<16x16xf32>
    %41 = math.exp %40 : vector<16x16xf32>
    %42 = arith.mulf %41, %36 : vector<16x16xf32>
    %43 = vector.shape_cast %42 : vector<16x16xf32> to vector<1x16x16xf32>
    %cst_14 = arith.constant dense<0.000000e+00> : vector<1xf32>
    %44 = vector.multi_reduction <add>, %43, %cst_14 [1, 2] : vector<1x16x16xf32> to vector<1xf32>
    %45 = vector.shape_cast %44 : vector<1xf32> to vector<1x1x1xf32>
    %46 = vector.extract %45[0, 0, 0] : f32 from vector<1x1x1xf32>
    %47 = arith.mulf %36, %36 : vector<16x16xf32>
    %48 = vector.shape_cast %47 : vector<16x16xf32> to vector<1x16x16xf32>
    %cst_15 = arith.constant dense<0.000000e+00> : vector<1xf32>
    %49 = vector.multi_reduction <add>, %48, %cst_15 [1, 2] : vector<1x16x16xf32> to vector<1xf32>
    %50 = vector.shape_cast %49 : vector<1xf32> to vector<1x1x1xf32>
    %51 = vector.extract %50[0, 0, 0] : f32 from vector<1x1x1xf32>
    %52 = arith.mulf %41, %41 : vector<16x16xf32>
    %53 = vector.shape_cast %52 : vector<16x16xf32> to vector<1x16x16xf32>
    %cst_16 = arith.constant dense<0.000000e+00> : vector<1xf32>
    %54 = vector.multi_reduction <add>, %53, %cst_16 [1, 2] : vector<1x16x16xf32> to vector<1xf32>
    %55 = vector.shape_cast %54 : vector<1xf32> to vector<1x1x1xf32>
    %56 = vector.extract %55[0, 0, 0] : f32 from vector<1x1x1xf32>
    %57 = arith.truncf %36 : vector<16x16xf32> to vector<16x16xbf16>
    %c0_17 = arith.constant 0 : index
    %c0_18 = arith.constant 0 : index
    %58 = vector.load %arg6[%c0_17, %c0_18] : memref<16x16xbf16, #tpu.memory_space<vmem>>, vector<16x16xbf16>
    %cst_19 = arith.constant dense<0.000000e+00> : vector<16x16xf32>
    %59 = tpu.matmul %58, %57, %cst_19 {dimension_numbers = #tpu.dot_dimension_numbers<[1], [0], [0], [1], [0, 0, 1, 1], [], []>} : vector<16x16xbf16>, vector<16x16xbf16>, vector<16x16xf32> -> vector<16x16xf32>
    %c0_20 = arith.constant 0 : index
    %c0_21 = arith.constant 0 : index
    %60 = vector.load %arg7[%c0_20, %c0_21] : memref<16x16xbf16, #tpu.memory_space<vmem>>, vector<16x16xbf16>
    %cst_22 = arith.constant dense<0.000000e+00> : vector<16x16xf32>
    %61 = tpu.matmul %57, %60, %cst_22 {dimension_numbers = #tpu.dot_dimension_numbers<[1], [0], [0], [1], [0, 0, 1, 1], [], []>} : vector<16x16xbf16>, vector<16x16xbf16>, vector<16x16xf32> -> vector<16x16xf32>
    %62 = arith.addf %59, %61 : vector<16x16xf32>
    %63 = arith.subf %62, %36 : vector<16x16xf32>
    %64 = arith.mulf %63, %36 : vector<16x16xf32>
    %cst_23 = arith.constant 5.000000e+00 : f32
    %65 = vector.broadcast %cst_23 : f32 to vector<16x16xf32>
    %66 = arith.cmpf oeq, %64, %65 : vector<16x16xf32>
    %cst_24 = arith.constant 0.000000e+00 : f32
    %67 = vector.broadcast %cst_24 : f32 to vector<16x16xf32>
    %68 = arith.select %66, %67, %64 : vector<16x16xi1>, vector<16x16xf32>
    %cst_25 = arith.constant 0.000000e+00 : f32
    %69 = vector.broadcast %cst_25 : f32 to vector<16x16xf32>
    %70 = arith.cmpf one, %68, %69 : vector<16x16xf32>
    %71 = arith.extui %70 : vector<16x16xi1> to vector<16x16xi32>
    %72 = arith.sitofp %71 : vector<16x16xi32> to vector<16x16xf32>
    %73 = vector.shape_cast %72 : vector<16x16xf32> to vector<1x16x16xf32>
    %cst_26 = arith.constant dense<0.000000e+00> : vector<1xf32>
    %74 = vector.multi_reduction <add>, %73, %cst_26 [1, 2] : vector<1x16x16xf32> to vector<1xf32>
    %75 = vector.shape_cast %74 : vector<1xf32> to vector<1x1x1xf32>
    %76 = vector.extract %75[0, 0, 0] : f32 from vector<1x1x1xf32>
    %cst_27 = arith.constant 0.000000e+00 : f32
    %77 = vector.broadcast %cst_27 : f32 to vector<16x16xf32>
    %78 = arith.cmpf one, %36, %77 : vector<16x16xf32>
    %79 = arith.extui %78 : vector<16x16xi1> to vector<16x16xi32>
    %80 = arith.sitofp %79 : vector<16x16xi32> to vector<16x16xf32>
    %81 = vector.shape_cast %80 : vector<16x16xf32> to vector<1x16x16xf32>
    %cst_28 = arith.constant dense<0.000000e+00> : vector<1xf32>
    %82 = vector.multi_reduction <add>, %81, %cst_28 [1, 2] : vector<1x16x16xf32> to vector<1xf32>
    %83 = vector.shape_cast %82 : vector<1xf32> to vector<1x1x1xf32>
    %84 = vector.extract %83[0, 0, 0] : f32 from vector<1x1x1xf32>
    %85 = arith.index_cast %arg0 : i32 to index
    %c0_29 = arith.constant 0 : index
    %86 = vector.load %arg3[%85, %c0_29] : memref<2x32xf32, #tpu.memory_space<vmem>>, vector<1x32xf32>
    %87 = arith.index_cast %arg0 : i32 to index
    %c0_30 = arith.constant 0 : index
    %88 = vector.load %arg4[%87, %c0_30] : memref<2x32xf32, #tpu.memory_space<vmem>>, vector<1x32xf32>
    %89 = arith.index_cast %arg0 : i32 to index
    %c0_31 = arith.constant 0 : index
    %90 = vector.load %arg5[%89, %c0_31] : memref<2x32xf32, #tpu.memory_space<vmem>>, vector<1x32xf32>
    %91 = arith.mulf %86, %90 : vector<1x32xf32>
    %92 = vector.shape_cast %91 : vector<1x32xf32> to vector<1x1x32xf32>
    %cst_32 = arith.constant dense<0.000000e+00> : vector<1xf32>
    %93 = vector.multi_reduction <add>, %92, %cst_32 [1, 2] : vector<1x1x32xf32> to vector<1xf32>
    %94 = vector.shape_cast %93 : vector<1xf32> to vector<1x1x1xf32>
    %95 = vector.extract %94[0, 0, 0] : f32 from vector<1x1x1xf32>
    %96 = arith.mulf %86, %86 : vector<1x32xf32>
    %97 = vector.shape_cast %96 : vector<1x32xf32> to vector<1x1x32xf32>
    %cst_33 = arith.constant dense<0.000000e+00> : vector<1xf32>
    %98 = vector.multi_reduction <add>, %97, %cst_33 [1, 2] : vector<1x1x32xf32> to vector<1xf32>
    %99 = vector.shape_cast %98 : vector<1xf32> to vector<1x1x1xf32>
    %100 = vector.extract %99[0, 0, 0] : f32 from vector<1x1x1xf32>
    %101 = math.sqrt %100 : f32
    %102 = arith.mulf %90, %90 : vector<1x32xf32>
    %103 = vector.shape_cast %102 : vector<1x32xf32> to vector<1x1x32xf32>
    %cst_34 = arith.constant dense<0.000000e+00> : vector<1xf32>
    %104 = vector.multi_reduction <add>, %103, %cst_34 [1, 2] : vector<1x1x32xf32> to vector<1xf32>
    %105 = vector.shape_cast %104 : vector<1xf32> to vector<1x1x1xf32>
    %106 = vector.extract %105[0, 0, 0] : f32 from vector<1x1x1xf32>
    %107 = math.sqrt %106 : f32
    %108 = arith.mulf %101, %107 : f32
    %cst_35 = arith.constant 9.99999993E-9 : f32
    %109 = arith.maximumf %108, %cst_35 : f32
    %110 = arith.divf %95, %109 : f32
    %cst_36 = arith.constant 9.99999974E-5 : f32
    %cst_37 = arith.constant 1.000000e+00 : f32
    %111 = arith.maximumf %cst_36, %110 : f32
    %112 = arith.minimumf %cst_37, %111 : f32
    %113 = arith.mulf %88, %90 : vector<1x32xf32>
    %114 = vector.shape_cast %113 : vector<1x32xf32> to vector<1x1x32xf32>
    %cst_38 = arith.constant dense<0.000000e+00> : vector<1xf32>
    %115 = vector.multi_reduction <add>, %114, %cst_38 [1, 2] : vector<1x1x32xf32> to vector<1xf32>
    %116 = vector.shape_cast %115 : vector<1xf32> to vector<1x1x1xf32>
    %117 = vector.extract %116[0, 0, 0] : f32 from vector<1x1x1xf32>
    %118 = arith.mulf %88, %88 : vector<1x32xf32>
    %119 = vector.shape_cast %118 : vector<1x32xf32> to vector<1x1x32xf32>
    %cst_39 = arith.constant dense<0.000000e+00> : vector<1xf32>
    %120 = vector.multi_reduction <add>, %119, %cst_39 [1, 2] : vector<1x1x32xf32> to vector<1xf32>
    %121 = vector.shape_cast %120 : vector<1xf32> to vector<1x1x1xf32>
    %122 = vector.extract %121[0, 0, 0] : f32 from vector<1x1x1xf32>
    %123 = math.sqrt %122 : f32
    %124 = arith.mulf %90, %90 : vector<1x32xf32>
    %125 = vector.shape_cast %124 : vector<1x32xf32> to vector<1x1x32xf32>
    %cst_40 = arith.constant dense<0.000000e+00> : vector<1xf32>
    %126 = vector.multi_reduction <add>, %125, %cst_40 [1, 2] : vector<1x1x32xf32> to vector<1xf32>
    %127 = vector.shape_cast %126 : vector<1xf32> to vector<1x1x1xf32>
    %128 = vector.extract %127[0, 0, 0] : f32 from vector<1x1x1xf32>
    %129 = math.sqrt %128 : f32
    %130 = arith.mulf %123, %129 : f32
    %cst_41 = arith.constant 9.99999993E-9 : f32
    %131 = arith.maximumf %130, %cst_41 : f32
    %132 = arith.divf %117, %131 : f32
    %cst_42 = arith.constant 9.99999974E-5 : f32
    %cst_43 = arith.constant 0.999899983 : f32
    %133 = arith.maximumf %cst_42, %132 : f32
    %134 = arith.minimumf %cst_43, %133 : f32
    %135 = math.log %112 : f32
    %cst_44 = arith.constant 0.000000e+00 : f32
    %136 = arith.subf %cst_44, %135 : f32
    %cst_45 = arith.constant 1.000000e+00 : f32
    %137 = arith.subf %cst_45, %134 : f32
    %138 = math.log %137 : f32
    %cst_46 = arith.constant 0.000000e+00 : f32
    %139 = arith.subf %cst_46, %138 : f32
    %140 = tpu.iota {dimensions = array<i32: 0>} : vector<8x128xi32>
    %cst_47 = arith.constant 0.000000e+00 : f32
    %141 = vector.broadcast %cst_47 : f32 to vector<8x128xf32>
    %c0_i32 = arith.constant 0 : i32
    %142 = vector.broadcast %c0_i32 : i32 to vector<8x128xi32>
    %143 = arith.cmpi eq, %140, %142 : vector<8x128xi32>
    %144 = vector.broadcast %34 : f32 to vector<8x128xf32>
    %145 = arith.select %143, %144, %141 : vector<8x128xi1>, vector<8x128xf32>
    %c1_i32 = arith.constant 1 : i32
    %146 = vector.broadcast %c1_i32 : i32 to vector<8x128xi32>
    %147 = arith.cmpi eq, %140, %146 : vector<8x128xi32>
    %148 = vector.broadcast %46 : f32 to vector<8x128xf32>
    %149 = arith.select %147, %148, %145 : vector<8x128xi1>, vector<8x128xf32>
    %c2_i32 = arith.constant 2 : i32
    %150 = vector.broadcast %c2_i32 : i32 to vector<8x128xi32>
    %151 = arith.cmpi eq, %140, %150 : vector<8x128xi32>
    %152 = vector.broadcast %51 : f32 to vector<8x128xf32>
    %153 = arith.select %151, %152, %149 : vector<8x128xi1>, vector<8x128xf32>
    %c3_i32 = arith.constant 3 : i32
    %154 = vector.broadcast %c3_i32 : i32 to vector<8x128xi32>
    %155 = arith.cmpi eq, %140, %154 : vector<8x128xi32>
    %156 = vector.broadcast %56 : f32 to vector<8x128xf32>
    %157 = arith.select %155, %156, %153 : vector<8x128xi1>, vector<8x128xf32>
    %c4_i32 = arith.constant 4 : i32
    %158 = vector.broadcast %c4_i32 : i32 to vector<8x128xi32>
    %159 = arith.cmpi eq, %140, %158 : vector<8x128xi32>
    %160 = vector.broadcast %76 : f32 to vector<8x128xf32>
    %161 = arith.select %159, %160, %157 : vector<8x128xi1>, vector<8x128xf32>
    %c5_i32 = arith.constant 5 : i32
    %162 = vector.broadcast %c5_i32 : i32 to vector<8x128xi32>
    %163 = arith.cmpi eq, %140, %162 : vector<8x128xi32>
    %164 = vector.broadcast %84 : f32 to vector<8x128xf32>
    %165 = arith.select %163, %164, %161 : vector<8x128xi1>, vector<8x128xf32>
    %c6_i32 = arith.constant 6 : i32
    %166 = vector.broadcast %c6_i32 : i32 to vector<8x128xi32>
    %167 = arith.cmpi eq, %140, %166 : vector<8x128xi32>
    %168 = vector.broadcast %136 : f32 to vector<8x128xf32>
    %169 = arith.select %167, %168, %165 : vector<8x128xi1>, vector<8x128xf32>
    %c7_i32 = arith.constant 7 : i32
    %170 = vector.broadcast %c7_i32 : i32 to vector<8x128xi32>
    %171 = arith.cmpi eq, %140, %170 : vector<8x128xi32>
    %172 = vector.broadcast %139 : f32 to vector<8x128xf32>
    %173 = arith.select %171, %172, %169 : vector<8x128xi1>, vector<8x128xf32>
    %c0_48 = arith.constant 0 : index
    %c0_49 = arith.constant 0 : index
    %c0_50 = arith.constant 0 : index
    %174 = vector.load %arg8[%c0_48, %c0_49, %c0_50] : memref<1x8x128xf32, #tpu.memory_space<vmem>>, vector<1x8x128xf32>
    %175 = vector.shape_cast %174 : vector<1x8x128xf32> to vector<8x128xf32>
    %176 = vector.shape_cast %173 : vector<8x128xf32> to vector<1x8x128xf32>
    tpu.vector_store %arg8[%c0_48, %c0_49, %c0_50], %176 {strides = array<i32>} : memref<1x8x128xf32, #tpu.memory_space<vmem>>, vector<1x8x128xf32>,
    return
  }
  func.func @transform_0(%arg0: i32) -> (i32, i32, i32, i32) {
    %c0_i32 = arith.constant 0 : i32
    %c0_i32_0 = arith.constant 0 : i32
    %c0_i32_1 = arith.constant 0 : i32
    %c0_i32_2 = arith.constant 0 : i32
    return %arg0, %c0_i32, %c0_i32_0, %c0_i32_1 : i32, i32, i32, i32
  }
  func.func @transform_1(%arg0: i32) -> (i32, i32, i32, i32) {
    %c0_i32 = arith.constant 0 : i32
    %c0_i32_0 = arith.constant 0 : i32
    %c0_i32_1 = arith.constant 0 : i32
    %c0_i32_2 = arith.constant 0 : i32
    return %arg0, %c0_i32, %c0_i32_0, %c0_i32_1 : i32, i32, i32, i32
  }
  func.func @transform_2(%arg0: i32) -> (i32, i32) {
    %c0_i32 = arith.constant 0 : i32
    %c0_i32_0 = arith.constant 0 : i32
    %c0_i32_1 = arith.constant 0 : i32
    return %c0_i32, %c0_i32_0 : i32, i32
  }
  func.func @transform_3(%arg0: i32) -> (i32, i32) {
    %c0_i32 = arith.constant 0 : i32
    %c0_i32_0 = arith.constant 0 : i32
    %c0_i32_1 = arith.constant 0 : i32
    return %c0_i32, %c0_i32_0 : i32, i32
  }
  func.func @transform_4(%arg0: i32) -> (i32, i32) {
    %c0_i32 = arith.constant 0 : i32
    %c0_i32_0 = arith.constant 0 : i32
    %c0_i32_1 = arith.constant 0 : i32
    return %c0_i32, %c0_i32_0 : i32, i32
  }
  func.func @transform_5(%arg0: i32) -> (i32, i32) {
    %c0_i32 = arith.constant 0 : i32
    %c0_i32_0 = arith.constant 0 : i32
    %c0_i32_1 = arith.constant 0 : i32
    return %c0_i32, %c0_i32_0 : i32, i32
  }
  func.func @transform_6(%arg0: i32) -> (i32, i32) {
    %c0_i32 = arith.constant 0 : i32
    %c0_i32_0 = arith.constant 0 : i32
    %c0_i32_1 = arith.constant 0 : i32
    return %c0_i32, %c0_i32_0 : i32, i32
  }
  func.func @transform_7(%arg0: i32) -> (i32, i32, i32) {
    %c0_i32 = arith.constant 0 : i32
    %c0_i32_0 = arith.constant 0 : i32
    %c0_i32_1 = arith.constant 0 : i32
    return %arg0, %c0_i32, %c0_i32_0 : i32, i32, i32
  }
}

</mosaic_0001>

<bundles_post_ra>
// kernel: match_and_mask_bd_and_bce_loss.1
= control target key start
LH: loop header
LB: loop body
LE: loop exit
PB: predicated region body
PF: predicated region fallthrough
CT: control target
= control target key end

     0   :  { %12 = vsyncpa [#allocation3], 0  ;;  %s1891_s0 = inlined_call_operand.hbm [shape: f32[2,4,16,16], index: 0, kind: input, shape index: {}]   ;;  %s1892_s1 = inlined_call_operand.hbm [shape: bf16[2,4,16,16], index: 1, kind: input, shape index: {}]   ;;  %s1893_s2 = inlined_call_operand.vmem [shape: f32[2,32], index: 2, kind: input, shape index: {}]   ;;  %s1894_s3 = inlined_call_operand.vmem [shape: f32[2,32], index: 3, kind: input, shape index: {}]   ;;  %s1895_s4 = inlined_call_operand.vmem [shape: f32[2,32], index: 4, kind: input, shape index: {}]   ;;  %s1896_s5 = inlined_call_operand.vmem [shape: bf16[16,16], index: 5, kind: input, shape index: {}, may-alias: {5,6}]   ;;  %s1897_s6 = inlined_call_operand.vmem [shape: bf16[16,16], index: 6, kind: input, shape index: {}, may-alias: {5,6}]   ;;  %s1898_s7 = inlined_call_operand.vmem [shape: f32[2,8,128], index: 7, kind: output, shape index: {}]  }
   0x1   :  { %14 = vsyncpa [#allocation3 + $0x1], 0 }
   0x2   :  { %15 = vsyncpa [#allocation5], 0 }
   0x3   :  { %17 = vsyncpa [#allocation5 + $0x1], 0  ;;  %s1372_s24 = smov 0   ;;  %s1374_s25 = smov 0  }
   0x4   :  { %s1376_s26 = smov 0   ;;  %s1378_s27 = smov 0  }
   0x5 LB: > { %s1391_s28 = sadd.s32 4294967295, %s1318_s27   ;;  %s1394_s29 = sadd.s32 1, %s1318_s27   ;;  %s1318_s27 = sphi %s1378_s27, %s1928_s27   ;;  %s1314_s26 = sphi %s1376_s26, %s1927_s26   ;;  %s1310_s25 = sphi %s1374_s25, %s1926_s25   ;;  %s1306_s24 = sphi %s1372_s24, %s1925_s24  }
   0x6   : > { %s27_s30 = ssub.s32 %s1318_s27, %s1394_s29  ;;  %s30_s8 = sadd.s32 1, %s1314_s26 }
   0x7   : > { %p28_p0 = scmp.eq.s32.totalorder %s27_s30, 0  ;;  %p37_p1 = scmp.ne.s32.totalorder %s1314_s26, %s1310_s25 }
   0x8   : > { %p38_p2 = scmp.eq.s32.totalorder %s1318_s27, 0  ;;  %p43_p3 = scmp.ne.s32.totalorder %s1310_s25, %s1306_s24 }
   0x9   : > { %s1404_s9 = scalar_select %p28_p0, %s1314_s26, %s30_s8  }
   0xa   : > { %p39_p4 = por %p38_p2, %p37_p1  ;;  %p44_p5 = scmp.eq.s32.totalorder %s1391_s28, 0 }
   0xb   : > { %p1123_p6 = scmp.lt.s32.totalorder %s1318_s27, 2  ;;  %s1413_s11 = sand.u32 1, %s1314_s26  }
   0xc   : > { %p1408_p7 = por %p44_p5, %p43_p3  ;;  %s1020_s12 = sshll.u32 %s1413_s11, 6 }
   0xd   : > { %s1041_s13 = sshll.u32 %s1318_s27, 10  ;;  %s243_s17 = scalar_lea.vmem [#allocation2], %s1020_s12 }
   0xe   : > { %s1900_s10 = scalar_select %p1408_p7, 1, 0 }
   0xf   : > { %s1420_s16 = scalar_lea.hbm %s1891_s0, %s1041_s13  ;;  %s250_s18 = sshll.u32 %s243_s17, 4  ;;  %s1422_s18 = int_to_ptr.vmem [resolvable:$true] %s250_s18 }
  0x10   : > { %p1424_p8 = pnand %p1123_p6, %p39_p4  ;;  %s240_s20 = scalar_lea.sflag [#allocation3], %s1413_s11 }
  0x11   : > { %s1220_s21 = scalar_lea.hbm %s1420_s16, 1024  ;;  %s1225_s24 = scalar_lea.hbm %s1891_s0, 2048 }
  0x12   : > { %p1221_p10 = scmp.ne.s32.totalorder %s1420_s16, %s1220_s21  ;;  %p1222_p11 = pneg %p1424_p8 }
  0x13   : > { %p1226_p0 = scmp.lt.u32.totalorder %s1420_s16, %s1891_s0  ;;  %p1227_p1 = scmp.lt.u32.totalorder %s1225_s24, %s1220_s21 }
  0x14   : > { %p1223_p12 = pnand %p1222_p11, %p1221_p10  ;;  %p1229_p3 = scmp.lt.u32.totalorder %s1220_s21, %s1420_s16 }
  0x15   : > { %p1228_p2 = por %p1227_p1, %p1226_p0 }
  0x16   : > { %p1224_p13 = pneg %p1223_p12 }
  0x17   : > { %p1230_p4 = por %p1229_p3, %p1228_p2 }
  0x19   : > { %p1231_p5 = pnand %p1230_p4, %p1224_p13 }
  0x1b   : > { %1234 = shalt.err (!%p1231_p5)
}
  0x1c   : > { %s1235_s12 = scalar_lea.vmem %s1422_s18, 1024  ;;  %s1320_s13 = smov [#allocation2]  }
  0x1d   : > { %p1236_p6 = scmp.ne.s32.totalorder %s1422_s18, %s1235_s12  ;;  %s1240_s14 = sshll.u32 %s1320_s13, 4  ;;  %s1241_s14 = int_to_ptr.vmem [resolvable:$false] %s1240_s14 }
  0x1e   : > { %s1242_s15 = scalar_lea.vmem %s1241_s14, 2048  ;;  %p1243_p9 = scmp.lt.s32.totalorder %s1422_s18, %s1241_s14 }
  0x1f   : > { %p1238_p10 = pnand %p1236_p6, %p1222_p11  ;;  %p1244_p0 = scmp.lt.s32.totalorder %s1242_s15, %s1235_s12 }
  0x21   : > { %p1239_p12 = pneg %p1238_p10  ;;  %p1245_p1 = por %p1244_p0, %p1243_p9 }
  0x23   : > { %p1246_p2 = pnand %p1245_p1, %p1239_p12 }
  0x25   : > { %1249 = shalt.err (!%p1246_p2)
}
  0x26   : > { %s1321_s17 = smov 128   ;;  %s1322_s21 = smov 8  }
  0x27   : > { %1119 = dma.hbm_to_vmem [thread:$0]  (!%p1424_p8), %s1420_s16, 1024, %s1422_s18, %s240_s20, %s1321_s17, %s1321_s17, %s1322_s21  }
  0x28   : > { %p279_p13 = scmp.lt.s32.totalorder %s1318_s27, 3  ;;  %s1023_s22 = sshll.u32 %s1413_s11, 5 }
  0x29   : > { %s1042_s23 = sshll.u32 %s1318_s27, 9  ;;  %p1902_p9 = scmp.ge.s32.totalorder %s1318_s27, 1 }
  0x2a   : > { %s1469_s12 = scalar_lea.hbm %s1892_s1, %s1042_s23  ;;  %s264_s13 = scalar_lea.vmem [#allocation4], %s1023_s22 }
  0x2b   : > { %p1462_p3 = pnand %p1902_p9, %p279_p13  ;;  %s271_s14 = sshll.u32 %s264_s13, 4  ;;  %s1471_s14 = int_to_ptr.vmem [resolvable:$true] %s271_s14 }
  0x2c   : > { %s261_s16 = scalar_lea.sflag [#allocation5], %s1413_s11  ;;  %s1250_s18 = scalar_lea.hbm %s1469_s12, 512 }
  0x2d   : > { %p1251_p4 = scmp.ne.s32.totalorder %s1469_s12, %s1250_s18  ;;  %s1255_s15 = scalar_lea.hbm %s1892_s1, 1024 }
  0x2e   : > { %p1256_p10 = scmp.lt.u32.totalorder %s1469_s12, %s1892_s1  ;;  %p1257_p12 = scmp.lt.u32.totalorder %s1255_s15, %s1250_s18 }
  0x2f   : > { %p1253_p5 = pnand %p1251_p4, %p1222_p11  ;;  %p1259_p1 = scmp.lt.u32.totalorder %s1250_s18, %s1469_s12 }
  0x30   : > { %p1258_p0 = por %p1257_p12, %p1256_p10 }
  0x31   : > { %p1254_p6 = pneg %p1253_p5 }
  0x32   : > { %p1260_p2 = por %p1259_p1, %p1258_p0 }
  0x34   : > { %p1261_p13 = pnand %p1260_p2, %p1254_p6 }
  0x36   : > { %1264 = shalt.err (!%p1261_p13)
}
  0x37   : > { %s1265_s22 = scalar_lea.vmem %s1471_s14, 512  ;;  %s1323_s23 = smov [#allocation4]  }
  0x38   : > { %p1266_p9 = scmp.ne.s32.totalorder %s1471_s14, %s1265_s22  ;;  %s1270_s30 = sshll.u32 %s1323_s23, 4  ;;  %s1271_s30 = int_to_ptr.vmem [resolvable:$false] %s1270_s30 }
  0x39   : > { %s1272_s8 = scalar_lea.vmem %s1271_s30, 1024  ;;  %p1273_p7 = scmp.lt.s32.totalorder %s1471_s14, %s1271_s30 }
  0x3a   : > { %p1268_p4 = pnand %p1266_p9, %p1222_p11  ;;  %p1274_p10 = scmp.lt.s32.totalorder %s1272_s8, %s1265_s22 }
  0x3c   : > { %p1269_p5 = pneg %p1268_p4  ;;  %p1275_p12 = por %p1274_p10, %p1273_p7 }
  0x3e   : > { %p1276_p0 = pnand %p1275_p12, %p1269_p5 }
  0x40   : > { %1279 = shalt.err (!%p1276_p0)
}
  0x41   : > { %s1324_s13 = smov 64   ;;  %s1325_s18 = smov 4  }
  0x42   : > { %1122 = dma.hbm_to_vmem [thread:$0]  (!%p1424_p8), %s1469_s12, 512, %s1471_s14, %s261_s16, %s1324_s13, %s1324_s13, %s1325_s18  }
  0x43   : > { %283 = sbr.rel (%p1462_p3) target bundleno = 926 (0x39e), region = 48  ;;  %s285_s27 = sand.u32 (!%p1462_p3), 1, %s1310_s25  }
  0x44   : > { %s1027_s20 = sshll.u32 (!%p1462_p3), %s285_s27, 6  ;;  %s286_s15 = scalar_lea.sflag (!%p1462_p3), [#allocation3], %s285_s27 }
  0x45   : > { %s1502_s17 = scalar_lea.vmem (!%p1462_p3), [#allocation2], %s1027_s20  ;;  %p1904_p7 = scmp.ne.s32.totalorder (!%p1462_p3), %s1900_s10, 0 }
  0x4a   : > { %1297 = dma.done.wait (%p1904_p7), %s286_s15, 1024  }
  0x4b   : > { %1299 = vsyncadd (%p1904_p7), %s286_s15, 4294966272  ;;  %s1028_s21 = sshll.u32 %s285_s27, 5  ;;  %s295_s19 = scalar_lea.sflag [#allocation5], %s285_s27 }
  0x4c   : > { %s1508_s11 = scalar_lea.vmem [#allocation4], %s1028_s21 }
  0x4d   : > { %1301 = dma.done.wait (%p1904_p7), %s295_s19, 512  }
  0x4e   : > { %1303 = vsyncadd (%p1904_p7), %s295_s19, 4294966784  ;;  %v1326_v0 = vmov 0.0   ;;  %vm1327_vm0 = vmmov 0   ;;  %v1166_v1 = vld [vmem:[%s1897_s6] sm:$0xff]   ;;  %vm562_vm1 = vcmask 130048   ;;  %v1538_v9 = vld [vmem:[%s1502_s17 + $0x8] sm:$0xff]  ;;  %s783_s23 = scalar_lea.vmem %s1893_s2, %s1391_s28  ;;  %s787_s13 = scalar_lea.vmem %s1895_s4, %s1391_s28 }
  0x4f   : > { %1062 = vmatprep.subr.bf16.mxu1 %v1326_v0  ;;  %1068 = vmatprep.subr.bf16.mxu0 %v1326_v0  ;;  %v346_v2 = vld [vmem:[%s1508_s11] sm:$0xff]   ;;  %v1541_v10 = vld [vmem:[%s1502_s17 + $0x10] sm:$0xff]  ;;  %v1546_v13 = vld [vmem:[%s1502_s17 + $0x18] sm:$0xff]  ;;  %v1571_v22 = vsub.f32 0.0, %v1538_v9  ;;  %s785_s20 = scalar_lea.vmem %s1894_s3, %s1391_s28  ;;  %s1328_s30 = smov 1e-08  }
  0x50   : > { %1064 = vmatprep.mubr.msk.bf16.mxu1 %vm1327_vm0, %v1326_v0  ;;  %1070 = vmatprep.mubr.msk.bf16.mxu0 %vm1327_vm0, %v1326_v0  ;;  %v1522_v3 = vunpack.c.l.bf16 %v346_v2  ;;  %v1524_v4 = vunpack.c.h.bf16 %v346_v2  ;;  %v1168_v5 = vld [vmem:[%s1896_s5] sm:$0xff]   ;;  %v1552_v15 = vld [vmem:[%s1502_s17 + $0x28] sm:$0xff]  ;;  %v1556_v17 = vld [vmem:[%s1502_s17 + $0x30] sm:$0xff]  ;;  %v1574_v23 = vsub.f32 0.0, %v1541_v10  ;;  %v1580_v25 = vsub.f32 0.0, %v1546_v13  ;;  %p333_p8 = scmp.lt.s32.totalorder %s1391_s28, 1 }
  0x51   : > { %1063 = vmatpush3.bf16.msra.mxu1 %v1166_v1  ;;  %1069 = vmatpush3.bf16.msra.mxu0 %v346_v2  ;;  %v1535_v8 = vld [vmem:[%s1502_s17] sm:$0xff]  ;;  %v1559_v18 = vld [vmem:[%s1502_s17 + $0x38] sm:$0xff]  ;;  %v1562_v19 = vld [vmem:[%s1508_s11 + $0x8] sm:$0xff]   ;;  %v1586_v27 = vsub.f32 0.0, %v1552_v15  ;;  %v1591_v30 = vsub.f32 0.0, %v1556_v17  ;;  %v371_v35 = vmax.f32 %v1571_v22, 0.0  ;;  %vm379_vm7 = vcmp.ne.f32.partialorder %v1571_v22, %v1571_v22 }
  0x52   : > { %v607_v6 = vmul.f32 %v1522_v3, %v1522_v3  ;;  %v608_v7 = vmul.f32 %v1524_v4, %v1524_v4  ;;  %v1549_v14 = vld [vmem:[%s1502_s17 + $0x20] sm:$0xff]  ;;  %v1565_v20 = vld [vmem:[%s1508_s11 + $0x10] sm:$0xff]   ;;  %v1568_v21 = vsub.f32 0.0, %v1535_v8  ;;  %v1577_v24 = vld [vmem:[%s1508_s11 + $0x18] sm:$0xff]   ;;  %v1045_v28 = vunpack.c.l.bf16 %v1562_v19  ;;  %s1930_s28 = smov (!%p333_p8, %s1391_s28), 1 }
  0x53   : > { %v1583_v26 = vsub.f32 0.0, %v1549_v14  ;;  %v1046_v29 = vunpack.c.h.bf16 %v1562_v19  ;;  %v1594_v31 = vsub.f32 0.0, %v1559_v18  ;;  %v1049_v32 = vunpack.c.l.bf16 %v1565_v20 }
  0x54   : > { %1065 = vmatmul.mubr.msk.bf16.vlgmr.msra.gmra.mrb[0].mxu1 %vm562_vm1, %v346_v2  ;;  %v609_v11 = vsel %vm562_vm1, %v607_v6, 0.0  ;;  %v610_v12 = vsel %vm562_vm1, %v608_v7, 0.0  ;;  %1071 = vmatmul.mubr.msk.bf16.vlgmr.msra.gmra.mrb[0].mxu0 %vm562_vm1, %v1168_v5  ;;  %v1050_v33 = vunpack.c.h.bf16 %v1565_v20  ;;  %v370_v34 = vmax.f32 %v1568_v21, 0.0 }
  0x55   : > { %v611_v16 = vadd.f32 %v610_v12, %v609_v11  ;;  %v1053_v36 = vunpack.c.l.bf16 %v1577_v24  ;;  %v394_v37 = vand.u32 2147483647, %v1568_v21  ;;  %v395_v38 = vand.u32 2147483647, %v1571_v22 }
  0x56   : > { %v396_v39 = vand.u32 2147483647, %v1574_v23  ;;  %v1054_v40 = vunpack.c.h.bf16 %v1577_v24  ;;  %v397_v41 = vand.u32 2147483647, %v1580_v25  ;;  %v398_v42 = vand.u32 2147483647, %v1583_v26 }
  0x57   : > { %612 = vadd.xlane.f32.xlu1 %v611_v16  ;;  %v399_v43 = vand.u32 2147483647, %v1586_v27  ;;  %v400_v44 = vand.u32 2147483647, %v1591_v30  ;;  %v401_v45 = vand.u32 2147483647, %v1594_v31  ;;  %vm378_vm6 = vcmp.ne.f32.partialorder %v1568_v21, %v1568_v21 }
  0x58   : > { %v402_v46 = vsub.f32 0.0, %v394_v37  ;;  %v403_v47 = vsub.f32 0.0, %v395_v38  ;;  %v404_v48 = vsub.f32 0.0, %v396_v39  ;;  %v405_v49 = vsub.f32 0.0, %v397_v41 }
  0x59   : > { %v406_v50 = vsub.f32 0.0, %v398_v42  ;;  %v407_v51 = vsub.f32 0.0, %v399_v43  ;;  %v408_v52 = vsub.f32 0.0, %v400_v44  ;;  %v409_v53 = vsub.f32 0.0, %v401_v45 }
  0x5a   : > { %v410_v54 = vmul.f32 1.442695, %v402_v46  ;;  %v412_v55 = vmul.f32 1.442695, %v403_v47  ;;  %v372_v56 = vmax.f32 %v1574_v23, 0.0  ;;  %v373_v57 = vmax.f32 %v1580_v25, 0.0 }
  0x5b   : > { %v414_v58 = vmul.f32 1.442695, %v404_v48  ;;  %v416_v59 = vmul.f32 1.442695, %v405_v49  ;;  %v418_v62 = vmul.f32 1.442695, %v406_v50  ;;  %vm380_vm8 = vcmp.ne.f32.partialorder %v1574_v23, %v1574_v23 }
  0x5c   : > { %1170 = vpow2.f32 %v410_v54  ;;  %v420_v2 = vmul.f32 1.442695, %v407_v51  ;;  %v422_v5 = vmul.f32 1.442695, %v408_v52  ;;  %v424_v6 = vmul.f32 1.442695, %v409_v53 }
  0x5d   : > { %1172 = vpow2.f32 %v412_v55  ;;  %v514_v7 = vsub.f32 1.0, %v1522_v3  ;;  %v515_v11 = vsub.f32 1.0, %v1524_v4  ;;  %v516_v12 = vsub.f32 1.0, %v1045_v28 }
  0x5e   : > { %1174 = vpow2.f32 %v414_v58  ;;  %v517_v16 = vsub.f32 1.0, %v1046_v29  ;;  %v518_v19 = vsub.f32 1.0, %v1049_v32  ;;  %v519_v20 = vsub.f32 1.0, %v1050_v33 }
  0x5f   : > { %1176 = vpow2.f32 %v416_v59  ;;  %v520_v24 = vsub.f32 1.0, %v1053_v36  ;;  %v1618_v37 = vsub.f32 1.0, %v1054_v40  ;;  %v1621_v38 = vmul.f32 %v514_v7, %v1535_v8 }
  0x60   : > { %1178 = vpow2.f32 %v418_v62  ;;  %v1624_v39 = vmul.f32 %v515_v11, %v1538_v9  ;;  %v1627_v41 = vmul.f32 %v516_v12, %v1541_v10  ;;  %v1630_v42 = vmul.f32 %v517_v16, %v1546_v13 }
  0x61   : > { %1180 = vpow2.f32 %v420_v2  ;;  %v530_v43 = vmul.f32 2.0, %v1522_v3  ;;  %v531_v44 = vmul.f32 2.0, %v1524_v4  ;;  %v532_v45 = vmul.f32 2.0, %v1045_v28 }
  0x62   : > { %1182 = vpow2.f32 %v422_v5  ;;  %v533_v46 = vmul.f32 2.0, %v1046_v29  ;;  %v534_v47 = vmul.f32 2.0, %v1049_v32  ;;  %v1635_v8 = vmul.f32 %v518_v19, %v1549_v14 }
  0x63   : > { %v1638_v9 = vmul.f32 %v519_v20, %v1552_v15  ;;  %v1641_v10 = vmul.f32 %v520_v24, %v1556_v17  ;;  %v535_v48 = vmul.f32 2.0, %v1050_v33  ;;  %1184 = vpow2.f32 %v424_v6 }
  0x64   : > { %v536_v13 = vmul.f32 2.0, %v1053_v36  ;;  %v537_v49 = vmul.f32 2.0, %v1054_v40  ;;  %v1643_v50 = vadd.f32 %v530_v43, %v514_v7  ;;  %v1645_v52 = vadd.f32 %v531_v44, %v515_v11 }
  0x65   : > { %v1647_v28 = vadd.f32 %v532_v45, %v516_v12  ;;  %v1649_v29 = vadd.f32 %v533_v46, %v517_v16  ;;  %v1651_v14 = vadd.f32 %v534_v47, %v518_v19  ;;  %v1653_v54 = vadd.f32 %v535_v48, %v519_v20 }
  0x66   : > { %v1171_v51 = vpop.eup %1170  ;;  %vm765_vm2 = vcmp.ne.f32.partialorder %v1522_v3, 0.0  ;;  %v1656_v62 = vadd.f32 %v536_v13, %v520_v24  ;;  %v1659_v2 = vadd.f32 %v537_v49, %v1618_v37  ;;  %vm766_vm3 = vcmp.ne.f32.partialorder %v1524_v4, 0.0 }
  0x67   : > { %v1173_v15 = vpop.eup %1172  ;;  %v426_v32 = vadd.f32 1.0, %v1171_v51  ;;  %v429_v53 = vmul.f32 -0.5, %v1171_v51  ;;  %v432_v17 = vand.u32 2147483647, %v1171_v51  ;;  %v1037_v16 = vsel %vm765_vm2, 1.0, %v1326_v0 }
  0x68   : > { %v1175_v33 = vpop.eup %1174  ;;  %v435_v36 = vadd.f32 1.0, %v1173_v15  ;;  %v438_v40 = vmul.f32 -0.5, %v1173_v15  ;;  %v441_v55 = vand.u32 2147483647, %v1173_v15  ;;  %vm381_vm10 = vcmp.ne.f32.partialorder %v1580_v25, %v1580_v25 }
  0x69   : > { %v1177_v58 = vpop.eup %1176  ;;  %1186 = vlog2.f32 %v426_v32  ;;  %v444_v59 = vadd.f32 1.0, %v1175_v33  ;;  %v430_v6 = vadd.f32 1.0, %v429_v53  ;;  %v447_v7 = vmul.f32 -0.5, %v1175_v33 }
  0x6a   : > { %v1179_v5 = vpop.eup %1178  ;;  %1188 = vlog2.f32 %v435_v36  ;;  %vm1662_vm4 = vcmp.lt.f32.partialorder %v432_v17, 0.0004427343  ;;  %v453_v12 = vadd.f32 1.0, %v1177_v58  ;;  %v439_v20 = vadd.f32 1.0, %v438_v40 }
  0x6b   : > { %1190 = vlog2.f32 %v444_v59  ;;  %v1181_v19 = vpop.eup %1180  ;;  %vm1667_vm5 = vcmp.lt.f32.partialorder %v441_v55, 0.0004427343  ;;  %v450_v43 = vand.u32 2147483647, %v1175_v33  ;;  %v456_v44 = vmul.f32 -0.5, %v1177_v58 }
  0x6c   : > { %v1671_v45 = vpop.eup %1182  ;;  %v448_v46 = vadd.f32 1.0, %v447_v7  ;;  %1192 = vlog2.f32 %v453_v12  ;;  %v462_v47 = vadd.f32 1.0, %v1179_v5  ;;  %v465_v48 = vmul.f32 -0.5, %v1179_v5 }
  0x6d   : > { %v431_v13 = vmul.f32 %v1171_v51, %v430_v6  ;;  %v457_v49 = vadd.f32 1.0, %v456_v44  ;;  %v459_v32 = vand.u32 2147483647, %v1177_v58  ;;  %v468_v53 = vand.u32 2147483647, %v1179_v5  ;;  %v1675_v17 = vpop.eup %1184 }
  0x6e   : > { %1194 = vlog2.f32 %v462_v47  ;;  %v466_v36 = vadd.f32 1.0, %v465_v48  ;;  %v471_v40 = vadd.f32 1.0, %v1181_v19  ;;  %v474_v55 = vmul.f32 -0.5, %v1181_v19 }
  0x6f   : > { %v440_v59 = vmul.f32 %v1173_v15, %v439_v20  ;;  %vm1681_vm9 = vcmp.lt.f32.partialorder %v450_v43, 0.0004427343  ;;  %v477_v51 = vand.u32 2147483647, %v1181_v19  ;;  %v480_v6 = vadd.f32 1.0, %v1671_v45 }
  0x70   : > { %v449_v12 = vmul.f32 %v1175_v33, %v448_v46  ;;  %1196 = vlog2.f32 %v471_v40  ;;  %v475_v44 = vadd.f32 1.0, %v474_v55  ;;  %v483_v1 = vmul.f32 -0.5, %v1671_v45 }
  0x71   : > { %v458_v47 = vmul.f32 %v1177_v58, %v457_v49  ;;  %vm1689_vm11 = vcmp.lt.f32.partialorder %v459_v32, 0.0004427343  ;;  %1198 = vlog2.f32 %v480_v6  ;;  %v489_v15 = vadd.f32 1.0, %v1675_v17 }
  0x72   : > { %v467_v43 = vmul.f32 %v1179_v5, %v466_v36  ;;  %vm1694_vm12 = vcmp.lt.f32.partialorder %v468_v53, 0.0004427343  ;;  %vm1698_vm13 = vcmp.lt.f32.partialorder %v477_v51, 0.0004427343  ;;  %v492_v46 = vmul.f32 -0.5, %v1675_v17 }
  0x73   : > { %v1187_v20 = vpop.eup %1186  ;;  %vm382_vm14 = vcmp.ne.f32.partialorder %v1583_v26, %v1583_v26  ;;  %v486_v32 = vand.u32 2147483647, %v1671_v45  ;;  %1200 = vlog2.f32 %v489_v15  ;;  %v1038_v5 = vsel %vm766_vm3, 1.0, %v1326_v0 }
  0x74   : > { %v1189_v58 = vpop.eup %1188  ;;  %v428_v49 = vmul.f32 0.6931472, %v1187_v20  ;;  %v476_v40 = vmul.f32 %v1181_v19, %v475_v44  ;;  %v484_v55 = vadd.f32 1.0, %v483_v1  ;;  %v495_v51 = vand.u32 2147483647, %v1675_v17 }
  0x75   : > { %v1191_v53 = vpop.eup %1190  ;;  %v437_v36 = vmul.f32 0.6931472, %v1189_v58  ;;  %vm383_vm15 = vcmp.ne.f32.partialorder %v1586_v27, %v1586_v27  ;;  %v771_v61 = vsel %vm562_vm1, %v1037_v16, 0.0  ;;  %v772_v15 = vsel %vm562_vm1, %v1038_v5, 0.0 }
  0x76   : > { %v434_v6 = vsel %vm1662_vm4, %v431_v13, %v428_v49  ;;  %v446_v20 = vmul.f32 0.6931472, %v1191_v53  ;;  %v1193_v60 = vpop.eup %1192  ;;  %vm384_vm0 = vcmp.ne.f32.partialorder %v1591_v30, %v1591_v30  ;;  %v493_v19 = vadd.f32 1.0, %v492_v46 }
  0x77   : > { %v443_v1 = vsel %vm1667_vm5, %v440_v59, %v437_v36  ;;  %v498_v44 = vadd.f32 %v434_v6, %v370_v34  ;;  %v773_v58 = vadd.f32 %v772_v15, %v771_v61  ;;  %v455_v13 = vmul.f32 0.6931472, %v1193_v60 }
  0x78   : > { %v452_v11 = vsel %vm1681_vm9, %v449_v12, %v446_v20  ;;  %vm1724_vm2 = vcmp.lt.f32.partialorder %v486_v32, 0.0004427343  ;;  %v499_v49 = vadd.f32 %v443_v1, %v371_v35  ;;  %v1195_v5 = vpop.eup %1194  ;;  %vm385_vm3 = vcmp.ne.f32.partialorder %v1594_v31, %v1594_v31 }
  0x79   : > { %v485_v24 = vmul.f32 %v1671_v45, %v484_v55  ;;  %vm1733_vm4 = vcmp.lt.f32.partialorder %v495_v51, 0.0004427343  ;;  %v500_v60 = vadd.f32 %v452_v11, %v372_v56  ;;  %v506_v61 = vsel %vm378_vm6, %v1568_v21, %v498_v44  ;;  %774 = vadd.xlane.f32.xlu1 %v773_v58 }
  0x7a   : > { %v461_v35 = vsel %vm1689_vm11, %v458_v47, %v455_v13  ;;  %v464_v59 = vmul.f32 0.6931472, %v1195_v5  ;;  %v507_v45 = vsel %vm379_vm7, %v1571_v22, %v499_v49  ;;  %v546_v7 = vmul.f32 %v1643_v50, %v506_v61  ;;  %v1197_v12 = vpop.eup %1196 }
  0x7b   : > { %v494_v56 = vmul.f32 %v1675_v17, %v493_v19  ;;  %v501_v46 = vadd.f32 %v461_v35, %v373_v57  ;;  %v508_v21 = vsel %vm380_vm8, %v1574_v23, %v500_v60  ;;  %v547_v47 = vmul.f32 %v1645_v52, %v507_v45  ;;  %v1199_v48 = vpop.eup %1198 }
  0x7c   : > { %v470_v32 = vsel %vm1694_vm12, %v467_v43, %v464_v59  ;;  %v473_v22 = vmul.f32 0.6931472, %v1197_v12  ;;  %v548_v50 = vmul.f32 %v1647_v28, %v508_v21  ;;  %v554_v53 = vadd.f32 %v546_v7, %v1621_v38 }
  0x7d   : > { %v482_v17 = vmul.f32 0.6931472, %v1199_v48  ;;  %v1921_v36 = vmax.f32 %v1583_v26, 0.0  ;;  %v509_v23 = vsel %vm381_vm10, %v1580_v25, %v501_v46  ;;  %v555_v52 = vadd.f32 %v547_v47, %v1624_v39  ;;  %v1201_v55 = vpop.eup %1200 }
  0x7e   : > { %v479_v63 = vsel %vm1698_vm13, %v476_v40, %v473_v22  ;;  %v549_v43 = vmul.f32 %v1649_v29, %v509_v23  ;;  %v556_v28 = vadd.f32 %v548_v50, %v1627_v41  ;;  %v563_v38 = vsel %vm562_vm1, %v554_v53, 0.0 }
  0x7f   : > { %v502_v57 = vadd.f32 %v470_v32, %v1921_v36  ;;  %v488_v51 = vsel %vm1724_vm2, %v485_v24, %v482_v17  ;;  %v491_v6 = vmul.f32 0.6931472, %v1201_v55  ;;  %v1922_v20 = vmax.f32 %v1586_v27, 0.0 }
  0x80   : > { %v1923_v39 = vmax.f32 %v1591_v30, 0.0  ;;  %v557_v41 = vadd.f32 %v549_v43, %v1630_v42  ;;  %v564_v40 = vsel %vm562_vm1, %v555_v52, 0.0  ;;  %v1924_v58 = vmax.f32 %v1594_v31, 0.0 }
  0x81   : > { %v503_v15 = vadd.f32 %v479_v63, %v1922_v20  ;;  %v510_v25 = vsel %vm382_vm14, %v1583_v26, %v502_v57  ;;  %v497_v1 = vsel %vm1733_vm4, %v494_v56, %v491_v6  ;;  %v565_v44 = vadd.f32 %v564_v40, %v563_v38  ;;  %v784_v57 = vld [vmem:[%s783_s23] sm:$0x1] }
  0x82   : > { %v504_v33 = vadd.f32 %v488_v51, %v1923_v39  ;;  %v550_v29 = vmul.f32 %v1651_v14, %v510_v25  ;;  %v566_v26 = vsel %vm562_vm1, %v556_v28, 0.0  ;;  %v505_v11 = vadd.f32 %v497_v1, %v1924_v58 }
  0x83   : > { %v511_v19 = vsel %vm383_vm15, %v1586_v27, %v503_v15  ;;  %v529_v16 = vmul.f32 %v1618_v37, %v1559_v18  ;;  %v567_v49 = vadd.f32 %v566_v26, %v565_v44  ;;  %v568_v5 = vsel %vm562_vm1, %v557_v41, 0.0 }
  0x84   : > { %v512_v42 = vsel %vm384_vm0, %v1591_v30, %v504_v33  ;;  %v551_v14 = vmul.f32 %v1653_v54, %v511_v19  ;;  %v558_v13 = vadd.f32 %v550_v29, %v1635_v8  ;;  %v513_v24 = vsel %vm385_vm3, %v1594_v31, %v505_v11 }
  0x85   : > { %v552_v27 = vmul.f32 %v1656_v62, %v512_v42  ;;  %v553_v54 = vmul.f32 %v1659_v2, %v513_v24  ;;  %v569_v60 = vadd.f32 %v568_v5, %v567_v49  ;;  %v588_v56 = vsub.f32 0.0, %v507_v45  ;;  %v788_v5 = vld [vmem:[%s787_s13] sm:$0x1] }
  0x86   : > { %v559_v34 = vadd.f32 %v551_v14, %v1638_v9  ;;  %v570_v30 = vsel %vm562_vm1, %v558_v13, 0.0  ;;  %v587_v9 = vsub.f32 0.0, %v506_v61  ;;  %vm790_vm5 = vcmask 253952  }
  0x87   : > { %v560_v8 = vadd.f32 %v552_v27, %v1641_v10  ;;  %v561_v37 = vadd.f32 %v553_v54, %v529_v16  ;;  %v571_v62 = vadd.f32 %v570_v30, %v569_v60  ;;  %v591_v21 = vmul.f32 1.442695, %v588_v56 }
  0x88   : > { %v572_v18 = vsel %vm562_vm1, %v559_v34, 0.0  ;;  %v589_v46 = vmul.f32 1.442695, %v587_v9  ;;  %v801_v23 = vmul.f32 %v784_v57, %v784_v57  ;;  %v789_v30 = vmul.f32 %v788_v5, %v784_v57 }
  0x89   : > { %v574_v35 = vsel %vm562_vm1, %v560_v8, 0.0  ;;  %v573_v59 = vadd.f32 %v572_v18, %v571_v62  ;;  %v576_v7 = vsel %vm562_vm1, %v561_v37, 0.0 }
  0x8a   : > { %1202 = vpow2.f32 %v589_v46  ;;  %v802_v52 = vsel %vm790_vm5, %v801_v23, 0.0  ;;  %v791_v62 = vsel %vm790_vm5, %v789_v30, 0.0 }
  0x8b   : > { %v575_v12 = vadd.f32 %v574_v35, %v573_v59  ;;  %1204 = vpow2.f32 %v591_v21  ;;  %v821_v35 = vmul.f32 %v788_v5, %v788_v5 }
  0x8d   : > { %v577_v31 = vadd.f32 %v576_v7, %v575_v12  ;;  %v822_v9 = vsel %vm790_vm5, %v821_v35, 0.0 }
  0x8f   : > { %578 = vadd.xlane.f32.xlu0 %v577_v31 }
  0x94   : > { %v1203_v10 = vpop.eup %1202 }
  0x95   : > { %v1205_v2 = vpop.eup %1204  ;;  %v593_v47 = vmul.f32 %v1203_v10, %v1522_v3  ;;  %v621_v22 = vmul.f32 %v1203_v10, %v1203_v10 }
  0x96   : > { %v594_v48 = vmul.f32 %v1205_v2, %v1524_v4  ;;  %v622_v50 = vmul.f32 %v1205_v2, %v1205_v2 }
  0x97   : > { %v595_v32 = vsel %vm562_vm1, %v593_v47, 0.0  ;;  %v623_v61 = vsel %vm562_vm1, %v621_v22, 0.0 }
  0x98   : > { %v596_v53 = vsel %vm562_vm1, %v594_v48, 0.0  ;;  %v624_v45 = vsel %vm562_vm1, %v622_v50, 0.0  ;;  %v786_v50 = vld [vmem:[%s785_s20] sm:$0x1] }
  0x99   : > { %v597_v17 = vadd.f32 %v596_v53, %v595_v32  ;;  %v625_v36 = vadd.f32 %v624_v45, %v623_v61  ;;  %v849_v53 = vmul.f32 %v788_v5, %v786_v50 }
  0x9b   : > { %598 = vadd.xlane.f32.xlu0 %v597_v17  ;;  %626 = vadd.xlane.f32.xlu1 %v625_v36  ;;  %v860_v17 = vmul.f32 %v786_v50, %v786_v50  ;;  %v850_v61 = vsel %vm790_vm5, %v849_v53, 0.0  ;;  %v899_v36 = vlaneseq }
  0x9d   : > { %v861_v45 = vsel %vm790_vm5, %v860_v17, 0.0  ;;  %v1848_v57 = vshrl.u32 %v899_v36, 7 }
  0x9f   : > { %803 = vadd.xlane.f32.xlu1 %v802_v52  ;;  %vm904_vm10 = vcmp.eq.s32.totalorder %v1848_v57, 1  ;;  %vm907_vm11 = vcmp.eq.s32.totalorder %v1848_v57, 2  ;;  %vm910_vm12 = vcmp.eq.s32.totalorder %v1848_v57, 3  ;;  %vm913_vm13 = vcmp.eq.s32.totalorder %v1848_v57, 4 }
  0xa0   : > { %vm916_vm14 = vcmp.eq.s32.totalorder %v1848_v57, 5 }
  0xa3   : > { %851 = vadd.xlane.f32.xlu1 %v850_v61 }
  0xe4   : > { %v613_v26 = vpop.xlane.xlu1 %612 }
  0xe5   : > { %v614_v42 = vrot.slane %v613_v26, 4 }
  0xe7   : > { %v615_v16 = vadd.f32 %v614_v42, %v613_v26 }
  0xe9   : > { %v616_v54 = vrot.slane %v615_v16, 2 }
  0xeb   : > { %v617_v7 = vadd.f32 %v616_v54, %v615_v16 }
  0xed   : > { %v618_v46 = vrot.slane %v617_v7, 1 }
  0xef   : > { %v619_v47 = vadd.f32 %v618_v46, %v617_v7 }
 0x11c   : > { %v579_v55 = vpop.xlane.xlu0 %578 }
 0x11d   : > { %v580_v63 = vrot.slane %v579_v55, 4 }
 0x11f   : > { %v581_v43 = vadd.f32 %v580_v63, %v579_v55 }
 0x121   : > { %v582_v28 = vrot.slane %v581_v43, 2 }
 0x123   : > { %v583_v6 = vadd.f32 %v582_v28, %v581_v43 }
 0x125   : > { %v584_v29 = vrot.slane %v583_v6, 1 }
 0x127   : > { %v683_v38 = vpop.f32.mrb[0].mxu1  ;;  %v732_v20 = vpop.f32.mrb[0].mxu0  ;;  %v585_v44 = vadd.f32 %v584_v29, %v583_v6 }
 0x128   : > { %v1066_v51 = vpop.f32.mrb[1].mxu1  ;;  %v733_v25 = vadd.f32 %v732_v20, %v683_v38  ;;  %v1072_v39 = vpop.f32.mrb[1].mxu0 }
 0x129   : > { %v686_v15 = vpop.f32.mrb[2].mxu1  ;;  %v735_v41 = vpop.f32.mrb[2].mxu0  ;;  %1076 = vpush %v585_v44 }
 0x12a   : > { %v1067_v33 = vpop.f32.mrb[3].mxu1  ;;  %v739_v40 = vsub.f32 %v733_v25, %v1522_v3  ;;  %v736_v1 = vadd.f32 %v735_v41, %v686_v15  ;;  %v1073_v19 = vpop.f32.mrb[3].mxu0 }
 0x12b   : > { %v599_v60 = vpop.xlane.xlu0 %598 }
 0x12c   : > { %v741_v58 = vmul.f32 %v739_v40, %v1522_v3  ;;  %v740_v11 = vsub.f32 %v736_v1, %v1524_v4  ;;  %v775_v3 = vpop.xlane.xlu1 %774  ;;  %v600_v18 = vrot.slane %v599_v60, 4 }
 0x12d   : > { %v776_v38 = vrot.slane %v775_v3, 4 }
 0x12e   : > { %v742_v14 = vmul.f32 %v740_v11, %v1524_v4  ;;  %vm743_vm6 = vcmp.eq.f32.partialorder %v741_v58, 5.0  ;;  %v601_v12 = vadd.f32 %v600_v18, %v599_v60 }
 0x12f   : > { %v745_v13 = vsel %vm743_vm6, 0.0, %v741_v58  ;;  %v777_v6 = vadd.f32 %v776_v38, %v775_v3  ;;  %vm919_vm6 = vcmp.eq.s32.totalorder %v1848_v57, 6 }
 0x130   : > { %vm744_vm7 = vcmp.eq.f32.partialorder %v742_v14, 5.0  ;;  %vm747_vm8 = vcmp.ne.f32.partialorder %v745_v13, 0.0  ;;  %v627_v37 = vpop.xlane.xlu1 %626 }
 0x131   : > { %v746_v27 = vsel %vm744_vm7, 0.0, %v742_v14  ;;  %v1035_v49 = vsel %vm747_vm8, 1.0, %v1326_v0  ;;  %v628_v59 = vrot.slane %v627_v37, 4  ;;  %v778_v15 = vrot.slane %v777_v6, 2 }
 0x132   : > { %vm748_vm9 = vcmp.ne.f32.partialorder %v746_v27, 0.0  ;;  %v753_v34 = vsel %vm562_vm1, %v1035_v49, 0.0  ;;  %vm922_vm7 = vcmp.eq.s32.totalorder %v1848_v57, 7 }
 0x133   : > { %v1036_v24 = vsel %vm748_vm9, 1.0, %v1326_v0  ;;  %v629_v31 = vadd.f32 %v628_v59, %v627_v37  ;;  %v602_v0 = vrot.slane %v601_v12, 2  ;;  %v779_v1 = vadd.f32 %v778_v15, %v777_v6 }
 0x134   : > { %v754_v4 = vsel %vm562_vm1, %v1036_v24, 0.0  ;;  %vm901_vm1 = vcmp.eq.s32.totalorder %v1848_v57, 0  ;;  %v804_v51 = vpop.xlane.xlu1 %803 }
 0x135   : > { %v755_v8 = vadd.f32 %v754_v4, %v753_v34  ;;  %v630_v56 = vrot.slane %v629_v31, 2  ;;  %v603_v21 = vadd.f32 %v602_v0, %v601_v12  ;;  %v805_v20 = vrot.slane %v804_v51, 4 }
 0x136   : > { %v780_v11 = vrot.slane %v779_v1, 1 }
 0x137   : > { %756 = vadd.xlane.f32.xlu0 %v755_v8  ;;  %v631_v10 = vadd.f32 %v630_v56, %v629_v31  ;;  %v604_v2 = vrot.slane %v603_v21, 1  ;;  %v806_v25 = vadd.f32 %v805_v20, %v804_v51 }
 0x138   : > { %v781_v49 = vadd.f32 %v780_v11, %v779_v1  ;;  %v852_v53 = vpop.xlane.xlu1 %851 }
 0x139   : > { %v632_v48 = vrot.slane %v631_v10, 1  ;;  %v605_v32 = vadd.f32 %v604_v2, %v603_v21  ;;  %v807_v41 = vrot.slane %v806_v25, 2  ;;  %v853_v61 = vrot.slane %v852_v53, 4 }
 0x13b   : > { %792 = vadd.xlane.f32.xlu0 %v791_v62  ;;  %v633_v22 = vadd.f32 %v632_v48, %v631_v10  ;;  %1078 = vpush %v605_v32  ;;  %v808_v42 = vadd.f32 %v807_v41, %v806_v25  ;;  %v854_v36 = vadd.f32 %v853_v61, %v852_v53 }
 0x13c   : > { %1080 = vpush %v619_v47 }
 0x13d   : > { %1082 = vpush %v633_v22  ;;  %v809_v5 = vrot.slane %v808_v42, 1 }
 0x13f   : > { %823 = vadd.xlane.f32.xlu0 %v822_v9  ;;  %v810_v34 = vadd.f32 %v809_v5, %v808_v42 }
 0x143   : > { %862 = vadd.xlane.f32.xlu0 %v861_v45 }
 0x15a   : > { %s1077_s15 = spop %1076 }
 0x15b   : > { %v902_v23 = vstv %s1077_s15  ;;  %s1329_s15 = smov 0.0001  }
 0x15c   : > { %v903_v52 = vsel %vm901_vm1, %v902_v23, 0.0 }
 0x16c   : > { %s1079_s17 = spop %1078 }
 0x16d   : > { %v905_v55 = vstv %s1079_s17  ;;  %s1081_s21 = spop %1080 }
 0x16e   : > { %v906_v63 = vsel %vm904_vm10, %v905_v55, %v903_v52  ;;  %v908_v43 = vstv %s1081_s21  ;;  %s1083_s19 = spop %1082  ;;  %v855_v52 = vrot.slane %v854_v36, 2  ;;  %s1330_s21 = smov 1.0  }
 0x16f   : > { %v909_v28 = vsel %vm907_vm11, %v908_v43, %v906_v63  ;;  %v911_v4 = vstv %s1083_s19 }
 0x170   : > { %v912_v54 = vsel %vm910_vm12, %v911_v4, %v909_v28  ;;  %v856_v43 = vadd.f32 %v855_v52, %v854_v36 }
 0x172   : > { %v857_v38 = vrot.slane %v856_v43, 1 }
 0x174   : > { %v858_v20 = vadd.f32 %v857_v38, %v856_v43 }
 0x1c4   : > { %v757_v39 = vpop.xlane.xlu0 %756 }
 0x1c5   : > { %v758_v33 = vrot.slane %v757_v39, 4 }
 0x1c7   : > { %v759_v29 = vadd.f32 %v758_v33, %v757_v39 }
 0x1c8   : > { %v793_v40 = vpop.xlane.xlu0 %792 }
 0x1c9   : > { %v760_v19 = vrot.slane %v759_v29, 2  ;;  %v794_v44 = vrot.slane %v793_v40, 4 }
 0x1cb   : > { %v795_v26 = vadd.f32 %v794_v44, %v793_v40  ;;  %v761_v58 = vadd.f32 %v760_v19, %v759_v29 }
 0x1cc   : > { %v824_v30 = vpop.xlane.xlu0 %823 }
 0x1cd   : > { %v796_v14 = vrot.slane %v795_v26, 2  ;;  %v762_v13 = vrot.slane %v761_v58, 1  ;;  %v825_v60 = vrot.slane %v824_v30, 4 }
 0x1cf   : > { %v763_v16 = vadd.f32 %v762_v13, %v761_v58  ;;  %v797_v27 = vadd.f32 %v796_v14, %v795_v26  ;;  %v826_v35 = vadd.f32 %v825_v60, %v824_v30 }
 0x1d0   : > { %v863_v17 = vpop.xlane.xlu0 %862 }
 0x1d1   : > { %1084 = vpush %v763_v16  ;;  %v798_v3 = vrot.slane %v797_v27, 1  ;;  %v827_v7 = vrot.slane %v826_v35, 2  ;;  %v864_v45 = vrot.slane %v863_v17, 4 }
 0x1d2   : > { %1086 = vpush %v781_v49 }
 0x1d3   : > { %v799_v24 = vadd.f32 %v798_v3, %v797_v27  ;;  %v828_v12 = vadd.f32 %v827_v7, %v826_v35  ;;  %v865_v23 = vadd.f32 %v864_v45, %v863_v17 }
 0x1d5   : > { %1088 = vpush %v799_v24  ;;  %v829_v0 = vrot.slane %v828_v12, 1  ;;  %v866_v55 = vrot.slane %v865_v23, 2 }
 0x1d6   : > { %1090 = vpush %v810_v34 }
 0x1d7   : > { %v830_v10 = vadd.f32 %v829_v0, %v828_v12  ;;  %v867_v28 = vadd.f32 %v866_v55, %v865_v23 }
 0x1d9   : > { %v868_v51 = vrot.slane %v867_v28, 1 }
 0x1db   : > { %v869_v15 = vadd.f32 %v868_v51, %v867_v28 }
 0x202   : > { %s1085_s11 = spop %1084 }
 0x203   : > { %v914_v8 = vstv %s1085_s11  ;;  %s1087_s24 = spop %1086 }
 0x204   : > { %v915_v18 = vsel %vm913_vm13, %v914_v8, %v912_v54  ;;  %v917_v37 = vstv %s1087_s24 }
 0x205   : > { %v1856_v62 = vsel %vm916_vm14, %v917_v37, %v915_v18 }
 0x206   : > { %s1858_s12 = spop %1088 }
 0x207   : > { %s1091_s10 = spop %1090 }
 0x208   : > { %v812_v59 = vstv %s1091_s10 }
 0x209   : > { %1206 = vrsqrt.f32 %v812_v59  ;;  %vm815_vm15 = vcmp.eq.f32.partialorder %v812_v59, inf  ;;  %v818_v56 = vand.u32 2147483648, %v812_v59  ;;  %vm817_vm0 = vcmp.eq.f32.partialorder %v812_v59, 0.0 }
 0x213   : > { %v1207_v31 = vpop.eup %1206 }
 0x214   : > { %v814_v9 = vmul.f32 %v1207_v31, %v812_v59 }
 0x216   : > { %v816_v46 = vsel %vm815_vm15, %v812_v59, %v814_v9 }
 0x217   : > { %v819_v21 = vsel %vm817_vm0, %v818_v56, %v816_v46 }
 0x218   : > { %1092 = vpush %v819_v21 }
 0x219   : > { %1094 = vpush %v830_v10 }
 0x249   : > { %s1093_s14 = spop %1092 }
 0x24a   : > { %s1095_s16 = spop %1094 }
 0x24b   : > { %v832_v2 = vstv %s1095_s16 }
 0x24c   : > { %1208 = vrsqrt.f32 %v832_v2  ;;  %vm835_vm2 = vcmp.eq.f32.partialorder %v832_v2, inf  ;;  %v838_v32 = vand.u32 2147483648, %v832_v2  ;;  %vm837_vm3 = vcmp.eq.f32.partialorder %v832_v2, 0.0 }
 0x256   : > { %v1209_v47 = vpop.eup %1208 }
 0x257   : > { %v834_v48 = vmul.f32 %v1209_v47, %v832_v2 }
 0x259   : > { %v836_v22 = vsel %vm835_vm2, %v832_v2, %v834_v48 }
 0x25a   : > { %v839_v50 = vsel %vm837_vm3, %v838_v32, %v836_v22 }
 0x25b   : > { %1096 = vpush %v839_v50 }
 0x28c   : > { %s1860_s22 = spop %1096 }
 0x28d   : > { %s841_s23 = smul.f32 %s1860_s22, %s1093_s14 }
 0x28f   : > { %s842_s8 = smax.f32 %s1328_s30, %s841_s23  ;;  %s1331_s23 = smov 0.9999  }
 0x290   : > { %v843_v63 = vstv %s842_s8 }
 0x291   : > { %1210 = vrcp.f32 %v843_v63 }
 0x29b   : > { %v1211_v6 = vpop.eup %1210 }
 0x29c   : > { %1098 = vpush %v1211_v6 }
 0x29d   : > { %1100 = vpush %v858_v20 }
 0x29e   : > { %1102 = vpush %v869_v15 }
 0x2cd   : > { %s1099_s13 = spop %1098 }
 0x2ce   : > { %s1864_s18 = spop %1100  ;;  %s846_s20 = smul.f32 %s1099_s13, %s1858_s12 }
 0x2cf   : > { %s1103_s27 = spop %1102 }
 0x2d0   : > { %v871_v25 = vstv %s1103_s27  ;;  %s847_s17 = smax.f32 %s1329_s15, %s846_s20  ;;  %s1029_s27 = sshll.u32 %s1930_s28, 3 }
 0x2d1   : > { %1212 = vrsqrt.f32 %v871_v25  ;;  %vm874_vm4 = vcmp.eq.f32.partialorder %v871_v25, inf  ;;  %v877_v29 = vand.u32 2147483648, %v871_v25  ;;  %vm876_vm5 = vcmp.eq.f32.partialorder %v871_v25, 0.0  ;;  %s848_s19 = smin.f32 %s1330_s21, %s847_s17  ;;  %s336_s21 = scalar_lea.vmem %s1898_s7, %s1029_s27 }
 0x2d2   : > { %v888_v1 = vstv %s848_s19 }
 0x2d3   : > { %1214 = vlog2.f32 %v888_v1 }
 0x2db   : > { %v1213_v39 = vpop.eup %1212 }
 0x2dc   : > { %v873_v33 = vmul.f32 %v1213_v39, %v871_v25 }
 0x2dd   : > { %v1215_v44 = vpop.eup %1214 }
 0x2de   : > { %v875_v41 = vsel %vm874_vm4, %v871_v25, %v873_v33  ;;  %v890_v58 = vmul.f32 0.6931472, %v1215_v44 }
 0x2df   : > { %v878_v40 = vsel %vm876_vm5, %v877_v29, %v875_v41 }
 0x2e0   : > { %1104 = vpush %v878_v40 }
 0x311   : > { %s1105_s11 = spop %1104 }
 0x312   : > { %s880_s24 = smul.f32 %s1105_s11, %s1860_s22 }
 0x314   : > { %s881_s10 = smax.f32 %s1328_s30, %s880_s24 }
 0x315   : > { %v882_v19 = vstv %s881_s10 }
 0x316   : > { %1216 = vrcp.f32 %v882_v19 }
 0x320   : > { %v1217_v26 = vpop.eup %1216 }
 0x321   : > { %1106 = vpush %v1217_v26 }
 0x322   : > { %1108 = vpush %v890_v58 }
 0x352   : > { %s1107_s12 = spop %1106 }
 0x353   : > { %s885_s14 = smul.f32 %s1107_s12, %s1864_s18  ;;  %s1109_s22 = spop %1108 }
 0x354   : > { %s892_s30 = ssub.f32 0.0, %s1109_s22 }
 0x355   : > { %s886_s16 = smax.f32 %s1329_s15, %s885_s14 }
 0x356   : > { %s887_s8 = smin.f32 %s1331_s23, %s886_s16  ;;  %v920_v13 = vstv %s892_s30 }
 0x357   : > { %s893_s13 = ssub.f32 1.0, %s887_s8  ;;  %v921_v16 = vsel %vm919_vm6, %v920_v13, %v1856_v62 }
 0x359   : > { %v894_v11 = vstv %s893_s13 }
 0x35a   : > { %1218 = vlog2.f32 %v894_v11 }
 0x364   : > { %v1219_v42 = vpop.eup %1218 }
 0x365   : > { %v896_v14 = vmul.f32 0.6931472, %v1219_v42 }
 0x367   : > { %1110 = vpush %v896_v14 }
 0x398   : > { %s1111_s20 = spop %1110 }
 0x399   : > { %s898_s17 = ssub.f32 0.0, %s1111_s20 }
 0x39b   : > { %v923_v27 = vstv %s898_s17 }
 0x39c   : > { %v924_v49 = vsel %vm922_vm7, %v923_v27, %v921_v16 }
 0x39d   : > { %925 = vst [vmem:[%s336_s21] sm:$0xff] %v924_v49 }
 0x39e PF: > { %p20_p11 = scmp.ge.s32.totalorder %s1394_s29, 4   ;;  %s1925_s24 = smov %s1310_s25 }
 0x39f   : > { %s1926_s25 = smov %s1314_s26  ;;  %s1927_s26 = smov %s1404_s9 }
 0x3a0   : > { %s1928_s27 = smov %s1394_s29  ;;  %22 = sbr.rel (!%p20_p11) target bundleno = 5 (0x5), region = 104 }
 0x3a7   :  { %945 = vsyncpa [#allocation3], 1 }
 0x3a8   :  { %947 = vsyncpa [#allocation3 + $0x1], 1 }
 0x3a9   :  { %948 = vsyncpa [#allocation5], 1 }
 0x3aa   :  { %950 = vsyncpa [#allocation5 + $0x1], 1 }

</bundles_post_ra>
